<compile_context>
chip_gen: v7x
topology: tpu7x:2x2x1
jax: 0.10.0
libtpu: 0.0.40
codegen_flags: <defaults>
</compile_context>

<pallas_src>
import numpy as np
import jax
import jax.numpy as jnp
from jax import lax
from jax.experimental import pallas as pl
from jax.experimental.pallas import tpu as pltpu

_LANE = 128          # lane width (last dim of every vreg)
_BLOCK_ROWS = 1024   # grid tile: (1024, 128) f32 = 512 KiB -> near-roofline DMA
_STRIP_ROWS = 32     # in-kernel strip: (32, 128) f32 = 4 vregs per temporary


# ----------------------------------------------------------------------------
# Setup glue (mirrors compute_second_derivatives / _solve_tridiagonal exactly)
# ----------------------------------------------------------------------------
def _solve_tridiagonal_np(a, b, c, d):
    n = len(d)
    c_prime = np.zeros_like(d)
    d_prime = np.zeros_like(d)
    c_prime[0] = c[0] / b[0]
    d_prime[0] = d[0] / b[0]
    for i in range(1, n):
        denom = b[i] - a[i] * c_prime[i - 1]
        c_prime[i] = c[i] / denom if i < n - 1 else 0.0
        d_prime[i] = (d[i] - a[i] * d_prime[i - 1]) / denom
    x = np.zeros_like(d)
    x[-1] = d_prime[-1]
    for i in reversed(range(n - 1)):
        x[i] = d_prime[i] - c_prime[i] * x[i + 1]
    return x


def compute_second_derivatives_np(x_points, y_points):
    x = np.asarray(x_points, dtype=np.float64)
    y = np.asarray(y_points, dtype=np.float64)
    intervals = x[1:] - x[:-1]
    dy = (y[1:] - y[:-1]) / intervals
    n = len(x)
    a = np.zeros_like(x)
    b = np.zeros_like(x)
    c = np.zeros_like(x)
    d = np.zeros_like(x)
    b[0] = 1.0
    d[0] = 0.0
    b[-1] = 1.0
    d[-1] = 0.0
    for i in range(1, n - 1):
        a[i] = intervals[i - 1] / 6.0
        b[i] = (intervals[i - 1] + intervals[i]) / 3.0
        c[i] = intervals[i] / 6.0
        d[i] = dy[i] - dy[i - 1]
    return _solve_tridiagonal_np(a, b, c, d)


def _segment_coefficients_np(x_points, y_points):
    """Per-interval cubic coefficients in t = x - x_i (float64 on host).

    On interval i:  f(x) = c0 + t*(c1 + t*(c2 + t*c3)),  t = x - x_i.
    Mathematically identical to the torchpme a/b form, and well conditioned
    (no large-coefficient cancellation in f32, unlike the absolute-x form).
    """
    x = np.asarray(x_points, dtype=np.float64)
    y = np.asarray(y_points, dtype=np.float64)
    d2y = compute_second_derivatives_np(x, y)
    h = x[1:] - x[:-1]
    c0 = y[:-1]
    c1 = (y[1:] - y[:-1]) / h - h * (2.0 * d2y[:-1] + d2y[1:]) / 6.0
    c2 = d2y[:-1] / 2.0
    c3 = (d2y[1:] - d2y[:-1]) / (6.0 * h)
    return d2y, x[:-1], c0, c1, c2, c3


# ----------------------------------------------------------------------------
# Pallas kernel: strip-mined fused searchsorted+gather (select sweep) + Horner
# ----------------------------------------------------------------------------
def _spline_kernel(xk_ref, c0_ref, c1_ref, c2_ref, c3_ref, x_ref, o_ref):
    # xk_ref / c*_ref : SMEM (n_intervals,) f32  (left knot + Horner coeffs)
    # x_ref / o_ref   : VMEM (block_rows, 128) f32, block_rows % _STRIP_ROWS == 0
    n_int = xk_ref.shape[0]                 # = n_knots - 1, small & static
    block_rows = x_ref.shape[0]
    n_strips = block_rows // _STRIP_ROWS

    def strip_body(s, carry):
        r = pl.multiple_of(s * _STRIP_ROWS, _STRIP_ROWS)
        x = x_ref[pl.ds(r, _STRIP_ROWS), :]

        # Initialize to interval 0 (also handles x < x_points[0], like clamp).
        xi = jnp.full_like(x, xk_ref[0])
        c0 = jnp.full_like(x, c0_ref[0])
        c1 = jnp.full_like(x, c1_ref[0])
        c2 = jnp.full_like(x, c2_ref[0])
        c3 = jnp.full_like(x, c3_ref[0])

        # Monotone sweep: x >= knots[k] (right=True semantics) selects
        # interval k.  Sweeping only up to n_int-1 reproduces the clamp to
        # n_knots-2.  Working set: ~6 strip-sized temps = ~28 vregs -> no
        # spills against the 64-vreg file.
        for k in range(1, n_int):
            xk = xk_ref[k]
            m = x >= xk
            xi = jnp.where(m, xk, xi)
            c0 = jnp.where(m, c0_ref[k], c0)
            c1 = jnp.where(m, c1_ref[k], c1)
            c2 = jnp.where(m, c2_ref[k], c2)
            c3 = jnp.where(m, c3_ref[k], c3)

        t = x - xi
        o_ref[pl.ds(r, _STRIP_ROWS), :] = c0 + t * (c1 + t * (c2 + t * c3))
        return carry

    lax.fori_loop(0, n_strips, strip_body, 0)


def cubic_spline_eval(xk, c0, c1, c2, c3, queries, *, block_rows=_BLOCK_ROWS):
    """Evaluate the cubic spline at `queries` (any shape) with a Pallas kernel."""
    orig_shape = queries.shape
    flat = queries.reshape(-1).astype(jnp.float32)
    nq = flat.shape[0]

    rows_needed = max(1, pl.cdiv(nq, _LANE))
    if rows_needed >= block_rows:
        blk = block_rows                                   # big streaming tile
    else:
        blk = pl.cdiv(rows_needed, _STRIP_ROWS) * _STRIP_ROWS   # tiny input
    rows = pl.cdiv(rows_needed, blk) * blk
    padded = rows * _LANE

    if padded != nq:
        # Only hit for ragged query counts; aligned case is copy-free.
        # TODO(synk): aligned-prefix + tail-call split to avoid this extra
        # HBM pass once the kernel approaches the streaming roofline.
        flat = jnp.pad(flat, (0, padded - nq))
    xs2d = flat.reshape(rows, _LANE)

    out2d = pl.pallas_call(
        _spline_kernel,
        out_shape=jax.ShapeDtypeStruct((rows, _LANE), jnp.float32),
        grid=(rows // blk,),
        in_specs=[
            pl.BlockSpec(memory_space=pltpu.MemorySpace.SMEM),  # xk
            pl.BlockSpec(memory_space=pltpu.MemorySpace.SMEM),  # c0
            pl.BlockSpec(memory_space=pltpu.MemorySpace.SMEM),  # c1
            pl.BlockSpec(memory_space=pltpu.MemorySpace.SMEM),  # c2
            pl.BlockSpec(memory_space=pltpu.MemorySpace.SMEM),  # c3
            pl.BlockSpec((blk, _LANE), lambda i: (i, 0)),
        ],
        out_specs=pl.BlockSpec((blk, _LANE), lambda i: (i, 0)),
        compiler_params=pltpu.CompilerParams(
            # TODO(synk): use pltpu.CORE_PARALLEL here on v7x (2 TCs/chip).
            dimension_semantics=("parallel",),
        ),
    )(xk, c0, c1, c2, c3, xs2d)

    out_flat = out2d.reshape(-1)
    if padded != nq:
        out_flat = out_flat[:nq]
    return out_flat.reshape(orig_shape)


class CubicSplinePallas:
    """JAX/Pallas equivalent of torchpme CubicSpline."""

    def __init__(self, x_points, y_points):
        x_np = np.asarray(x_points)
        y_np = np.asarray(y_points)
        d2y, xk, c0, c1, c2, c3 = _segment_coefficients_np(x_np, y_np)
        self.x_points = jnp.asarray(x_np, dtype=jnp.float32)
        self.y_points = jnp.asarray(y_np, dtype=jnp.float32)
        self.d2y_points = jnp.asarray(d2y, dtype=jnp.float32)
        # Per-interval tables consumed by the kernel (flat 1-D, SMEM-friendly).
        self.xk = jnp.asarray(xk, dtype=jnp.float32)
        self.c0 = jnp.asarray(c0, dtype=jnp.float32)
        self.c1 = jnp.asarray(c1, dtype=jnp.float32)
        self.c2 = jnp.asarray(c2, dtype=jnp.float32)
        self.c3 = jnp.asarray(c3, dtype=jnp.float32)

    def __call__(self, x):
        return cubic_spline_eval(self.xk, self.c0, self.c1, self.c2, self.c3, x)


# ----------------------------------------------------------------------------
# Pure-JAX reference (mirrors the PyTorch forward) for a sanity check
# ----------------------------------------------------------------------------
def _reference_forward(x_points, y_points, d2y_points, x):
    intervals = x_points[1:] - x_points[:-1]
    h2over6_tab = intervals ** 2 / 6.0
    i = jnp.searchsorted(x_points, x, side="right") - 1
    i = jnp.clip(i, 0, x_points.shape[0] - 2)
    h = intervals[i]
    a = (x_points[i + 1] - x) / h
    b = (x - x_points[i]) / h
    h2over6 = h2over6_tab[i]
    return a * (y_points[i] + (a * a - 1.0) * d2y_points[i] * h2over6) + b * (
        y_points[i + 1] + (b * b - 1.0) * d2y_points[i + 1] * h2over6
    )


if __name__ == "__main__":
    # Deterministic spline knots (module __init__ inputs): n = 16 points.
    n_knots = 16
    x_knots_np = np.linspace(0.0, 3.0, n_knots)
    y_knots_np = np.sin(2.0 * x_knots_np) + 0.25 * x_knots_np
    spline = CubicSplinePallas(x_knots_np, y_knots_np)

    # Deterministic query points.
    key = jax.random.PRNGKey(0)
    queries = jax.random.uniform(
        key, (500,), minval=0.0, maxval=3.0, dtype=jnp.float32
    )

    out = spline(queries)
    out = jax.block_until_ready(out)

    ref = _reference_forward(
        spline.x_points, spline.y_points, spline.d2y_points, queries
    )
    if not np.allclose(np.asarray(out), np.asarray(ref), rtol=1e-4, atol=1e-5):
        raise AssertionError("Pallas spline output mismatch vs reference")

    print("KERNEL_OK")
</pallas_src>

<mosaic_0001>
module attributes {stable_mosaic.version = 11 : i64} {
  func.func @_spline_kernel(%arg0: i32, %arg1: memref<15xf32, #tpu.memory_space<smem>>, %arg2: memref<15xf32, #tpu.memory_space<smem>>, %arg3: memref<15xf32, #tpu.memory_space<smem>>, %arg4: memref<15xf32, #tpu.memory_space<smem>>, %arg5: memref<15xf32, #tpu.memory_space<smem>>, %arg6: memref<32x128xf32, #tpu.memory_space<vmem>>, %arg7: memref<32x128xf32, #tpu.memory_space<vmem>>) attributes {dimension_semantics = [#tpu.dimension_semantics<parallel>], iteration_bounds = array<i64: 1>, scalar_prefetch = 0 : i64, scratch_operands = 0 : i64, tpu.core_type = #tpu.core_type<tc>, window_params = [{transform_indices = @transform_0, window_bounds = array<i64: 15>}, {transform_indices = @transform_1, window_bounds = array<i64: 15>}, {transform_indices = @transform_2, window_bounds = array<i64: 15>}, {transform_indices = @transform_3, window_bounds = array<i64: 15>}, {transform_indices = @transform_4, window_bounds = array<i64: 15>}, {transform_indices = @transform_5, window_bounds = array<i64: 32, 128>}, {transform_indices = @transform_6, window_bounds = array<i64: 32, 128>}]} {
    %c0_i32 = arith.constant 0 : i32
    %c32_i32 = arith.constant 32 : i32
    %0 = arith.muli %c0_i32, %c32_i32 : i32
    %1 = tpu.assume_multiple %0, 32 : i32
    %2 = arith.index_cast %1 : i32 to index
    %c0 = arith.constant 0 : index
    %3 = vector.load %arg6[%2, %c0] : memref<32x128xf32, #tpu.memory_space<vmem>>, vector<32x128xf32>
    %c0_0 = arith.constant 0 : index
    %4 = memref.load %arg1[%c0_0] : memref<15xf32, #tpu.memory_space<smem>>
    %5 = vector.broadcast %4 : f32 to vector<32x128xf32>
    %c0_1 = arith.constant 0 : index
    %6 = memref.load %arg2[%c0_1] : memref<15xf32, #tpu.memory_space<smem>>
    %7 = vector.broadcast %6 : f32 to vector<32x128xf32>
    %c0_2 = arith.constant 0 : index
    %8 = memref.load %arg3[%c0_2] : memref<15xf32, #tpu.memory_space<smem>>
    %9 = vector.broadcast %8 : f32 to vector<32x128xf32>
    %c0_3 = arith.constant 0 : index
    %10 = memref.load %arg4[%c0_3] : memref<15xf32, #tpu.memory_space<smem>>
    %11 = vector.broadcast %10 : f32 to vector<32x128xf32>
    %c0_4 = arith.constant 0 : index
    %12 = memref.load %arg5[%c0_4] : memref<15xf32, #tpu.memory_space<smem>>
    %13 = vector.broadcast %12 : f32 to vector<32x128xf32>
    %c1 = arith.constant 1 : index
    %14 = memref.load %arg1[%c1] : memref<15xf32, #tpu.memory_space<smem>>
    %15 = vector.broadcast %14 : f32 to vector<32x128xf32>
    %16 = arith.cmpf oge, %3, %15 : vector<32x128xf32>
    %17 = vector.broadcast %14 : f32 to vector<32x128xf32>
    %18 = arith.select %16, %17, %5 : vector<32x128xi1>, vector<32x128xf32>
    %c1_5 = arith.constant 1 : index
    %19 = memref.load %arg2[%c1_5] : memref<15xf32, #tpu.memory_space<smem>>
    %20 = vector.broadcast %19 : f32 to vector<32x128xf32>
    %21 = arith.select %16, %20, %7 : vector<32x128xi1>, vector<32x128xf32>
    %c1_6 = arith.constant 1 : index
    %22 = memref.load %arg3[%c1_6] : memref<15xf32, #tpu.memory_space<smem>>
    %23 = vector.broadcast %22 : f32 to vector<32x128xf32>
    %24 = arith.select %16, %23, %9 : vector<32x128xi1>, vector<32x128xf32>
    %c1_7 = arith.constant 1 : index
    %25 = memref.load %arg4[%c1_7] : memref<15xf32, #tpu.memory_space<smem>>
    %26 = vector.broadcast %25 : f32 to vector<32x128xf32>
    %27 = arith.select %16, %26, %11 : vector<32x128xi1>, vector<32x128xf32>
    %c1_8 = arith.constant 1 : index
    %28 = memref.load %arg5[%c1_8] : memref<15xf32, #tpu.memory_space<smem>>
    %29 = vector.broadcast %28 : f32 to vector<32x128xf32>
    %30 = arith.select %16, %29, %13 : vector<32x128xi1>, vector<32x128xf32>
    %c2 = arith.constant 2 : index
    %31 = memref.load %arg1[%c2] : memref<15xf32, #tpu.memory_space<smem>>
    %32 = vector.broadcast %31 : f32 to vector<32x128xf32>
    %33 = arith.cmpf oge, %3, %32 : vector<32x128xf32>
    %34 = vector.broadcast %31 : f32 to vector<32x128xf32>
    %35 = arith.select %33, %34, %18 : vector<32x128xi1>, vector<32x128xf32>
    %c2_9 = arith.constant 2 : index
    %36 = memref.load %arg2[%c2_9] : memref<15xf32, #tpu.memory_space<smem>>
    %37 = vector.broadcast %36 : f32 to vector<32x128xf32>
    %38 = arith.select %33, %37, %21 : vector<32x128xi1>, vector<32x128xf32>
    %c2_10 = arith.constant 2 : index
    %39 = memref.load %arg3[%c2_10] : memref<15xf32, #tpu.memory_space<smem>>
    %40 = vector.broadcast %39 : f32 to vector<32x128xf32>
    %41 = arith.select %33, %40, %24 : vector<32x128xi1>, vector<32x128xf32>
    %c2_11 = arith.constant 2 : index
    %42 = memref.load %arg4[%c2_11] : memref<15xf32, #tpu.memory_space<smem>>
    %43 = vector.broadcast %42 : f32 to vector<32x128xf32>
    %44 = arith.select %33, %43, %27 : vector<32x128xi1>, vector<32x128xf32>
    %c2_12 = arith.constant 2 : index
    %45 = memref.load %arg5[%c2_12] : memref<15xf32, #tpu.memory_space<smem>>
    %46 = vector.broadcast %45 : f32 to vector<32x128xf32>
    %47 = arith.select %33, %46, %30 : vector<32x128xi1>, vector<32x128xf32>
    %c3 = arith.constant 3 : index
    %48 = memref.load %arg1[%c3] : memref<15xf32, #tpu.memory_space<smem>>
    %49 = vector.broadcast %48 : f32 to vector<32x128xf32>
    %50 = arith.cmpf oge, %3, %49 : vector<32x128xf32>
    %51 = vector.broadcast %48 : f32 to vector<32x128xf32>
    %52 = arith.select %50, %51, %35 : vector<32x128xi1>, vector<32x128xf32>
    %c3_13 = arith.constant 3 : index
    %53 = memref.load %arg2[%c3_13] : memref<15xf32, #tpu.memory_space<smem>>
    %54 = vector.broadcast %53 : f32 to vector<32x128xf32>
    %55 = arith.select %50, %54, %38 : vector<32x128xi1>, vector<32x128xf32>
    %c3_14 = arith.constant 3 : index
    %56 = memref.load %arg3[%c3_14] : memref<15xf32, #tpu.memory_space<smem>>
    %57 = vector.broadcast %56 : f32 to vector<32x128xf32>
    %58 = arith.select %50, %57, %41 : vector<32x128xi1>, vector<32x128xf32>
    %c3_15 = arith.constant 3 : index
    %59 = memref.load %arg4[%c3_15] : memref<15xf32, #tpu.memory_space<smem>>
    %60 = vector.broadcast %59 : f32 to vector<32x128xf32>
    %61 = arith.select %50, %60, %44 : vector<32x128xi1>, vector<32x128xf32>
    %c3_16 = arith.constant 3 : index
    %62 = memref.load %arg5[%c3_16] : memref<15xf32, #tpu.memory_space<smem>>
    %63 = vector.broadcast %62 : f32 to vector<32x128xf32>
    %64 = arith.select %50, %63, %47 : vector<32x128xi1>, vector<32x128xf32>
    %c4 = arith.constant 4 : index
    %65 = memref.load %arg1[%c4] : memref<15xf32, #tpu.memory_space<smem>>
    %66 = vector.broadcast %65 : f32 to vector<32x128xf32>
    %67 = arith.cmpf oge, %3, %66 : vector<32x128xf32>
    %68 = vector.broadcast %65 : f32 to vector<32x128xf32>
    %69 = arith.select %67, %68, %52 : vector<32x128xi1>, vector<32x128xf32>
    %c4_17 = arith.constant 4 : index
    %70 = memref.load %arg2[%c4_17] : memref<15xf32, #tpu.memory_space<smem>>
    %71 = vector.broadcast %70 : f32 to vector<32x128xf32>
    %72 = arith.select %67, %71, %55 : vector<32x128xi1>, vector<32x128xf32>
    %c4_18 = arith.constant 4 : index
    %73 = memref.load %arg3[%c4_18] : memref<15xf32, #tpu.memory_space<smem>>
    %74 = vector.broadcast %73 : f32 to vector<32x128xf32>
    %75 = arith.select %67, %74, %58 : vector<32x128xi1>, vector<32x128xf32>
    %c4_19 = arith.constant 4 : index
    %76 = memref.load %arg4[%c4_19] : memref<15xf32, #tpu.memory_space<smem>>
    %77 = vector.broadcast %76 : f32 to vector<32x128xf32>
    %78 = arith.select %67, %77, %61 : vector<32x128xi1>, vector<32x128xf32>
    %c4_20 = arith.constant 4 : index
    %79 = memref.load %arg5[%c4_20] : memref<15xf32, #tpu.memory_space<smem>>
    %80 = vector.broadcast %79 : f32 to vector<32x128xf32>
    %81 = arith.select %67, %80, %64 : vector<32x128xi1>, vector<32x128xf32>
    %c5 = arith.constant 5 : index
    %82 = memref.load %arg1[%c5] : memref<15xf32, #tpu.memory_space<smem>>
    %83 = vector.broadcast %82 : f32 to vector<32x128xf32>
    %84 = arith.cmpf oge, %3, %83 : vector<32x128xf32>
    %85 = vector.broadcast %82 : f32 to vector<32x128xf32>
    %86 = arith.select %84, %85, %69 : vector<32x128xi1>, vector<32x128xf32>
    %c5_21 = arith.constant 5 : index
    %87 = memref.load %arg2[%c5_21] : memref<15xf32, #tpu.memory_space<smem>>
    %88 = vector.broadcast %87 : f32 to vector<32x128xf32>
    %89 = arith.select %84, %88, %72 : vector<32x128xi1>, vector<32x128xf32>
    %c5_22 = arith.constant 5 : index
    %90 = memref.load %arg3[%c5_22] : memref<15xf32, #tpu.memory_space<smem>>
    %91 = vector.broadcast %90 : f32 to vector<32x128xf32>
    %92 = arith.select %84, %91, %75 : vector<32x128xi1>, vector<32x128xf32>
    %c5_23 = arith.constant 5 : index
    %93 = memref.load %arg4[%c5_23] : memref<15xf32, #tpu.memory_space<smem>>
    %94 = vector.broadcast %93 : f32 to vector<32x128xf32>
    %95 = arith.select %84, %94, %78 : vector<32x128xi1>, vector<32x128xf32>
    %c5_24 = arith.constant 5 : index
    %96 = memref.load %arg5[%c5_24] : memref<15xf32, #tpu.memory_space<smem>>
    %97 = vector.broadcast %96 : f32 to vector<32x128xf32>
    %98 = arith.select %84, %97, %81 : vector<32x128xi1>, vector<32x128xf32>
    %c6 = arith.constant 6 : index
    %99 = memref.load %arg1[%c6] : memref<15xf32, #tpu.memory_space<smem>>
    %100 = vector.broadcast %99 : f32 to vector<32x128xf32>
    %101 = arith.cmpf oge, %3, %100 : vector<32x128xf32>
    %102 = vector.broadcast %99 : f32 to vector<32x128xf32>
    %103 = arith.select %101, %102, %86 : vector<32x128xi1>, vector<32x128xf32>
    %c6_25 = arith.constant 6 : index
    %104 = memref.load %arg2[%c6_25] : memref<15xf32, #tpu.memory_space<smem>>
    %105 = vector.broadcast %104 : f32 to vector<32x128xf32>
    %106 = arith.select %101, %105, %89 : vector<32x128xi1>, vector<32x128xf32>
    %c6_26 = arith.constant 6 : index
    %107 = memref.load %arg3[%c6_26] : memref<15xf32, #tpu.memory_space<smem>>
    %108 = vector.broadcast %107 : f32 to vector<32x128xf32>
    %109 = arith.select %101, %108, %92 : vector<32x128xi1>, vector<32x128xf32>
    %c6_27 = arith.constant 6 : index
    %110 = memref.load %arg4[%c6_27] : memref<15xf32, #tpu.memory_space<smem>>
    %111 = vector.broadcast %110 : f32 to vector<32x128xf32>
    %112 = arith.select %101, %111, %95 : vector<32x128xi1>, vector<32x128xf32>
    %c6_28 = arith.constant 6 : index
    %113 = memref.load %arg5[%c6_28] : memref<15xf32, #tpu.memory_space<smem>>
    %114 = vector.broadcast %113 : f32 to vector<32x128xf32>
    %115 = arith.select %101, %114, %98 : vector<32x128xi1>, vector<32x128xf32>
    %c7 = arith.constant 7 : index
    %116 = memref.load %arg1[%c7] : memref<15xf32, #tpu.memory_space<smem>>
    %117 = vector.broadcast %116 : f32 to vector<32x128xf32>
    %118 = arith.cmpf oge, %3, %117 : vector<32x128xf32>
    %119 = vector.broadcast %116 : f32 to vector<32x128xf32>
    %120 = arith.select %118, %119, %103 : vector<32x128xi1>, vector<32x128xf32>
    %c7_29 = arith.constant 7 : index
    %121 = memref.load %arg2[%c7_29] : memref<15xf32, #tpu.memory_space<smem>>
    %122 = vector.broadcast %121 : f32 to vector<32x128xf32>
    %123 = arith.select %118, %122, %106 : vector<32x128xi1>, vector<32x128xf32>
    %c7_30 = arith.constant 7 : index
    %124 = memref.load %arg3[%c7_30] : memref<15xf32, #tpu.memory_space<smem>>
    %125 = vector.broadcast %124 : f32 to vector<32x128xf32>
    %126 = arith.select %118, %125, %109 : vector<32x128xi1>, vector<32x128xf32>
    %c7_31 = arith.constant 7 : index
    %127 = memref.load %arg4[%c7_31] : memref<15xf32, #tpu.memory_space<smem>>
    %128 = vector.broadcast %127 : f32 to vector<32x128xf32>
    %129 = arith.select %118, %128, %112 : vector<32x128xi1>, vector<32x128xf32>
    %c7_32 = arith.constant 7 : index
    %130 = memref.load %arg5[%c7_32] : memref<15xf32, #tpu.memory_space<smem>>
    %131 = vector.broadcast %130 : f32 to vector<32x128xf32>
    %132 = arith.select %118, %131, %115 : vector<32x128xi1>, vector<32x128xf32>
    %c8 = arith.constant 8 : index
    %133 = memref.load %arg1[%c8] : memref<15xf32, #tpu.memory_space<smem>>
    %134 = vector.broadcast %133 : f32 to vector<32x128xf32>
    %135 = arith.cmpf oge, %3, %134 : vector<32x128xf32>
    %136 = vector.broadcast %133 : f32 to vector<32x128xf32>
    %137 = arith.select %135, %136, %120 : vector<32x128xi1>, vector<32x128xf32>
    %c8_33 = arith.constant 8 : index
    %138 = memref.load %arg2[%c8_33] : memref<15xf32, #tpu.memory_space<smem>>
    %139 = vector.broadcast %138 : f32 to vector<32x128xf32>
    %140 = arith.select %135, %139, %123 : vector<32x128xi1>, vector<32x128xf32>
    %c8_34 = arith.constant 8 : index
    %141 = memref.load %arg3[%c8_34] : memref<15xf32, #tpu.memory_space<smem>>
    %142 = vector.broadcast %141 : f32 to vector<32x128xf32>
    %143 = arith.select %135, %142, %126 : vector<32x128xi1>, vector<32x128xf32>
    %c8_35 = arith.constant 8 : index
    %144 = memref.load %arg4[%c8_35] : memref<15xf32, #tpu.memory_space<smem>>
    %145 = vector.broadcast %144 : f32 to vector<32x128xf32>
    %146 = arith.select %135, %145, %129 : vector<32x128xi1>, vector<32x128xf32>
    %c8_36 = arith.constant 8 : index
    %147 = memref.load %arg5[%c8_36] : memref<15xf32, #tpu.memory_space<smem>>
    %148 = vector.broadcast %147 : f32 to vector<32x128xf32>
    %149 = arith.select %135, %148, %132 : vector<32x128xi1>, vector<32x128xf32>
    %c9 = arith.constant 9 : index
    %150 = memref.load %arg1[%c9] : memref<15xf32, #tpu.memory_space<smem>>
    %151 = vector.broadcast %150 : f32 to vector<32x128xf32>
    %152 = arith.cmpf oge, %3, %151 : vector<32x128xf32>
    %153 = vector.broadcast %150 : f32 to vector<32x128xf32>
    %154 = arith.select %152, %153, %137 : vector<32x128xi1>, vector<32x128xf32>
    %c9_37 = arith.constant 9 : index
    %155 = memref.load %arg2[%c9_37] : memref<15xf32, #tpu.memory_space<smem>>
    %156 = vector.broadcast %155 : f32 to vector<32x128xf32>
    %157 = arith.select %152, %156, %140 : vector<32x128xi1>, vector<32x128xf32>
    %c9_38 = arith.constant 9 : index
    %158 = memref.load %arg3[%c9_38] : memref<15xf32, #tpu.memory_space<smem>>
    %159 = vector.broadcast %158 : f32 to vector<32x128xf32>
    %160 = arith.select %152, %159, %143 : vector<32x128xi1>, vector<32x128xf32>
    %c9_39 = arith.constant 9 : index
    %161 = memref.load %arg4[%c9_39] : memref<15xf32, #tpu.memory_space<smem>>
    %162 = vector.broadcast %161 : f32 to vector<32x128xf32>
    %163 = arith.select %152, %162, %146 : vector<32x128xi1>, vector<32x128xf32>
    %c9_40 = arith.constant 9 : index
    %164 = memref.load %arg5[%c9_40] : memref<15xf32, #tpu.memory_space<smem>>
    %165 = vector.broadcast %164 : f32 to vector<32x128xf32>
    %166 = arith.select %152, %165, %149 : vector<32x128xi1>, vector<32x128xf32>
    %c10 = arith.constant 10 : index
    %167 = memref.load %arg1[%c10] : memref<15xf32, #tpu.memory_space<smem>>
    %168 = vector.broadcast %167 : f32 to vector<32x128xf32>
    %169 = arith.cmpf oge, %3, %168 : vector<32x128xf32>
    %170 = vector.broadcast %167 : f32 to vector<32x128xf32>
    %171 = arith.select %169, %170, %154 : vector<32x128xi1>, vector<32x128xf32>
    %c10_41 = arith.constant 10 : index
    %172 = memref.load %arg2[%c10_41] : memref<15xf32, #tpu.memory_space<smem>>
    %173 = vector.broadcast %172 : f32 to vector<32x128xf32>
    %174 = arith.select %169, %173, %157 : vector<32x128xi1>, vector<32x128xf32>
    %c10_42 = arith.constant 10 : index
    %175 = memref.load %arg3[%c10_42] : memref<15xf32, #tpu.memory_space<smem>>
    %176 = vector.broadcast %175 : f32 to vector<32x128xf32>
    %177 = arith.select %169, %176, %160 : vector<32x128xi1>, vector<32x128xf32>
    %c10_43 = arith.constant 10 : index
    %178 = memref.load %arg4[%c10_43] : memref<15xf32, #tpu.memory_space<smem>>
    %179 = vector.broadcast %178 : f32 to vector<32x128xf32>
    %180 = arith.select %169, %179, %163 : vector<32x128xi1>, vector<32x128xf32>
    %c10_44 = arith.constant 10 : index
    %181 = memref.load %arg5[%c10_44] : memref<15xf32, #tpu.memory_space<smem>>
    %182 = vector.broadcast %181 : f32 to vector<32x128xf32>
    %183 = arith.select %169, %182, %166 : vector<32x128xi1>, vector<32x128xf32>
    %c11 = arith.constant 11 : index
    %184 = memref.load %arg1[%c11] : memref<15xf32, #tpu.memory_space<smem>>
    %185 = vector.broadcast %184 : f32 to vector<32x128xf32>
    %186 = arith.cmpf oge, %3, %185 : vector<32x128xf32>
    %187 = vector.broadcast %184 : f32 to vector<32x128xf32>
    %188 = arith.select %186, %187, %171 : vector<32x128xi1>, vector<32x128xf32>
    %c11_45 = arith.constant 11 : index
    %189 = memref.load %arg2[%c11_45] : memref<15xf32, #tpu.memory_space<smem>>
    %190 = vector.broadcast %189 : f32 to vector<32x128xf32>
    %191 = arith.select %186, %190, %174 : vector<32x128xi1>, vector<32x128xf32>
    %c11_46 = arith.constant 11 : index
    %192 = memref.load %arg3[%c11_46] : memref<15xf32, #tpu.memory_space<smem>>
    %193 = vector.broadcast %192 : f32 to vector<32x128xf32>
    %194 = arith.select %186, %193, %177 : vector<32x128xi1>, vector<32x128xf32>
    %c11_47 = arith.constant 11 : index
    %195 = memref.load %arg4[%c11_47] : memref<15xf32, #tpu.memory_space<smem>>
    %196 = vector.broadcast %195 : f32 to vector<32x128xf32>
    %197 = arith.select %186, %196, %180 : vector<32x128xi1>, vector<32x128xf32>
    %c11_48 = arith.constant 11 : index
    %198 = memref.load %arg5[%c11_48] : memref<15xf32, #tpu.memory_space<smem>>
    %199 = vector.broadcast %198 : f32 to vector<32x128xf32>
    %200 = arith.select %186, %199, %183 : vector<32x128xi1>, vector<32x128xf32>
    %c12 = arith.constant 12 : index
    %201 = memref.load %arg1[%c12] : memref<15xf32, #tpu.memory_space<smem>>
    %202 = vector.broadcast %201 : f32 to vector<32x128xf32>
    %203 = arith.cmpf oge, %3, %202 : vector<32x128xf32>
    %204 = vector.broadcast %201 : f32 to vector<32x128xf32>
    %205 = arith.select %203, %204, %188 : vector<32x128xi1>, vector<32x128xf32>
    %c12_49 = arith.constant 12 : index
    %206 = memref.load %arg2[%c12_49] : memref<15xf32, #tpu.memory_space<smem>>
    %207 = vector.broadcast %206 : f32 to vector<32x128xf32>
    %208 = arith.select %203, %207, %191 : vector<32x128xi1>, vector<32x128xf32>
    %c12_50 = arith.constant 12 : index
    %209 = memref.load %arg3[%c12_50] : memref<15xf32, #tpu.memory_space<smem>>
    %210 = vector.broadcast %209 : f32 to vector<32x128xf32>
    %211 = arith.select %203, %210, %194 : vector<32x128xi1>, vector<32x128xf32>
    %c12_51 = arith.constant 12 : index
    %212 = memref.load %arg4[%c12_51] : memref<15xf32, #tpu.memory_space<smem>>
    %213 = vector.broadcast %212 : f32 to vector<32x128xf32>
    %214 = arith.select %203, %213, %197 : vector<32x128xi1>, vector<32x128xf32>
    %c12_52 = arith.constant 12 : index
    %215 = memref.load %arg5[%c12_52] : memref<15xf32, #tpu.memory_space<smem>>
    %216 = vector.broadcast %215 : f32 to vector<32x128xf32>
    %217 = arith.select %203, %216, %200 : vector<32x128xi1>, vector<32x128xf32>
    %c13 = arith.constant 13 : index
    %218 = memref.load %arg1[%c13] : memref<15xf32, #tpu.memory_space<smem>>
    %219 = vector.broadcast %218 : f32 to vector<32x128xf32>
    %220 = arith.cmpf oge, %3, %219 : vector<32x128xf32>
    %221 = vector.broadcast %218 : f32 to vector<32x128xf32>
    %222 = arith.select %220, %221, %205 : vector<32x128xi1>, vector<32x128xf32>
    %c13_53 = arith.constant 13 : index
    %223 = memref.load %arg2[%c13_53] : memref<15xf32, #tpu.memory_space<smem>>
    %224 = vector.broadcast %223 : f32 to vector<32x128xf32>
    %225 = arith.select %220, %224, %208 : vector<32x128xi1>, vector<32x128xf32>
    %c13_54 = arith.constant 13 : index
    %226 = memref.load %arg3[%c13_54] : memref<15xf32, #tpu.memory_space<smem>>
    %227 = vector.broadcast %226 : f32 to vector<32x128xf32>
    %228 = arith.select %220, %227, %211 : vector<32x128xi1>, vector<32x128xf32>
    %c13_55 = arith.constant 13 : index
    %229 = memref.load %arg4[%c13_55] : memref<15xf32, #tpu.memory_space<smem>>
    %230 = vector.broadcast %229 : f32 to vector<32x128xf32>
    %231 = arith.select %220, %230, %214 : vector<32x128xi1>, vector<32x128xf32>
    %c13_56 = arith.constant 13 : index
    %232 = memref.load %arg5[%c13_56] : memref<15xf32, #tpu.memory_space<smem>>
    %233 = vector.broadcast %232 : f32 to vector<32x128xf32>
    %234 = arith.select %220, %233, %217 : vector<32x128xi1>, vector<32x128xf32>
    %c14 = arith.constant 14 : index
    %235 = memref.load %arg1[%c14] : memref<15xf32, #tpu.memory_space<smem>>
    %236 = vector.broadcast %235 : f32 to vector<32x128xf32>
    %237 = arith.cmpf oge, %3, %236 : vector<32x128xf32>
    %238 = vector.broadcast %235 : f32 to vector<32x128xf32>
    %239 = arith.select %237, %238, %222 : vector<32x128xi1>, vector<32x128xf32>
    %c14_57 = arith.constant 14 : index
    %240 = memref.load %arg2[%c14_57] : memref<15xf32, #tpu.memory_space<smem>>
    %241 = vector.broadcast %240 : f32 to vector<32x128xf32>
    %242 = arith.select %237, %241, %225 : vector<32x128xi1>, vector<32x128xf32>
    %c14_58 = arith.constant 14 : index
    %243 = memref.load %arg3[%c14_58] : memref<15xf32, #tpu.memory_space<smem>>
    %244 = vector.broadcast %243 : f32 to vector<32x128xf32>
    %245 = arith.select %237, %244, %228 : vector<32x128xi1>, vector<32x128xf32>
    %c14_59 = arith.constant 14 : index
    %246 = memref.load %arg4[%c14_59] : memref<15xf32, #tpu.memory_space<smem>>
    %247 = vector.broadcast %246 : f32 to vector<32x128xf32>
    %248 = arith.select %237, %247, %231 : vector<32x128xi1>, vector<32x128xf32>
    %c14_60 = arith.constant 14 : index
    %249 = memref.load %arg5[%c14_60] : memref<15xf32, #tpu.memory_space<smem>>
    %250 = vector.broadcast %249 : f32 to vector<32x128xf32>
    %251 = arith.select %237, %250, %234 : vector<32x128xi1>, vector<32x128xf32>
    %252 = arith.subf %3, %239 : vector<32x128xf32>
    %253 = arith.mulf %252, %251 : vector<32x128xf32>
    %254 = arith.addf %248, %253 : vector<32x128xf32>
    %255 = arith.mulf %252, %254 : vector<32x128xf32>
    %256 = arith.addf %245, %255 : vector<32x128xf32>
    %257 = arith.mulf %252, %256 : vector<32x128xf32>
    %258 = arith.addf %242, %257 : vector<32x128xf32>
    %259 = arith.index_cast %1 : i32 to index
    %c0_61 = arith.constant 0 : index
    %260 = vector.load %arg7[%259, %c0_61] : memref<32x128xf32, #tpu.memory_space<vmem>>, vector<32x128xf32>
    tpu.vector_store %arg7[%259, %c0_61], %258 {strides = array<i32>} : memref<32x128xf32, #tpu.memory_space<vmem>>, vector<32x128xf32>,
    %c1_i32 = arith.constant 1 : i32
    return
  }
  func.func @transform_0(%arg0: i32) -> i32 {
    %c0_i32 = arith.constant 0 : i32
    %c0_i32_0 = arith.constant 0 : i32
    return %c0_i32 : i32
  }
  func.func @transform_1(%arg0: i32) -> i32 {
    %c0_i32 = arith.constant 0 : i32
    %c0_i32_0 = arith.constant 0 : i32
    return %c0_i32 : i32
  }
  func.func @transform_2(%arg0: i32) -> i32 {
    %c0_i32 = arith.constant 0 : i32
    %c0_i32_0 = arith.constant 0 : i32
    return %c0_i32 : i32
  }
  func.func @transform_3(%arg0: i32) -> i32 {
    %c0_i32 = arith.constant 0 : i32
    %c0_i32_0 = arith.constant 0 : i32
    return %c0_i32 : i32
  }
  func.func @transform_4(%arg0: i32) -> i32 {
    %c0_i32 = arith.constant 0 : i32
    %c0_i32_0 = arith.constant 0 : i32
    return %c0_i32 : i32
  }
  func.func @transform_5(%arg0: i32) -> (i32, i32) {
    %c0_i32 = arith.constant 0 : i32
    %c0_i32_0 = arith.constant 0 : i32
    return %arg0, %c0_i32 : i32, i32
  }
  func.func @transform_6(%arg0: i32) -> (i32, i32) {
    %c0_i32 = arith.constant 0 : i32
    %c0_i32_0 = arith.constant 0 : i32
    return %arg0, %c0_i32 : i32, i32
  }
}

</mosaic_0001>

<bundles_post_ra>
// kernel: tpu_custom_call.1
= control target key start
LH: loop header
LB: loop body
LE: loop exit
PB: predicated region body
PF: predicated region fallthrough
CT: control target
= control target key end

     0   :  { %11 = vsyncpa [#allocation5], 0  ;;  %s2364_s0 = inlined_call_operand.hbm [shape: f32[15], index: 0, kind: input, shape index: {}]   ;;  %s2365_s1 = inlined_call_operand.vmem [shape: f32[15], index: 1, kind: input, shape index: {}]   ;;  %s2366_s2 = inlined_call_operand.vmem [shape: f32[15], index: 2, kind: input, shape index: {}]   ;;  %s2367_s3 = inlined_call_operand.vmem [shape: f32[15], index: 3, kind: input, shape index: {}]   ;;  %s2368_s4 = inlined_call_operand.vmem [shape: f32[15], index: 4, kind: input, shape index: {}]   ;;  %s2369_s5 = inlined_call_operand.hbm [shape: f32[32,128], index: 5, kind: input, shape index: {}]   ;;  %s2370_s6 = inlined_call_operand.hbm [shape: f32[32,128], index: 6, kind: output, shape index: {}]  }
   0x1   :  { %12 = vsyncpa [#allocation6], 0 }
   0x2   :  { %13 = vsyncpa [#allocation9], 0 }
   0x3   :  { %14 = vsyncpa [#allocation12], 0 }
   0x4   :  { %15 = vsyncpa [#allocation3], 0  ;;  %s41_s23 = sshll.u32 %s2366_s2, 4  ;;  %s42_s23 = int_to_ptr.vmem [resolvable:$true] %s41_s23 }
   0x5   :  { %16 = vsyncpa [#allocation4], 0  ;;  %s718_s24 = scalar_lea.vmem %s42_s23, 16  ;;  %p723_p1 = scmp.lt.s32.totalorder %s42_s23, %s42_s23 }
   0x6   :  { %p719_p0 = scmp.ne.s32.totalorder %s42_s23, %s718_s24  ;;  %p724_p2 = scmp.lt.s32.totalorder %s718_s24, %s718_s24 }
   0x8   :  { %p725_p3 = por %p724_p2, %p723_p1 }
   0xa   :  { %p726_p4 = pnand %p725_p3, %p719_p0 }
   0xc   :  { %729 = shalt.err (!%p726_p4)
}
   0xd   :  { %s832_s25 = smov [#allocation8]   ;;  %s730_s28 = scalar_lea.hbm %s2364_s0, 16 }
   0xe   :  { %44 = dma.vmem_to_smem %s42_s23, 16, %s832_s25, [#allocation9]  }
   0xf   :  { %p731_p5 = scmp.ne.s32.totalorder %s2364_s0, %s730_s28  ;;  %p734_p6 = scmp.lt.u32.totalorder %s730_s28, %s2364_s0 }
  0x11   :  { %p736_p7 = pnand %p734_p6, %p731_p5 }
  0x13   :  { %739 = shalt.err (!%p736_p7)
}
  0x14   :  { %s833_s8 = smov [#allocation2]   ;;  %s31_s13 = sshll.u32 %s2365_s1, 4  ;;  %s32_s13 = int_to_ptr.vmem [resolvable:$true] %s31_s13 }
  0x15   :  { %24 = dma.hbm_to_smem %s2364_s0, 16, %s833_s8, [#allocation5]  }
  0x16   :  { %s51_s16 = sshll.u32 %s2367_s3, 4  ;;  %s740_s17 = scalar_lea.vmem %s32_s13, 16  ;;  %s52_s16 = int_to_ptr.vmem [resolvable:$true] %s51_s16 }
  0x17   :  { %p741_p8 = scmp.ne.s32.totalorder %s32_s13, %s740_s17  ;;  %p745_p9 = scmp.lt.s32.totalorder %s32_s13, %s32_s13 }
  0x18   :  { %p746_p10 = scmp.lt.s32.totalorder %s740_s17, %s740_s17 }
  0x1a   :  { %p747_p11 = por %p746_p10, %p745_p9 }
  0x1c   :  { %p748_p12 = pnand %p747_p11, %p741_p8 }
  0x1e   :  { %751 = shalt.err (!%p748_p12)
}
  0x1f   :  { %s834_s18 = smov [#allocation7]   ;;  %s752_s0 = scalar_lea.vmem %s52_s16, 16 }
  0x20   :  { %34 = dma.vmem_to_smem %s32_s13, 16, %s834_s18, [#allocation6]  }
  0x21   :  { %p753_p13 = scmp.ne.s32.totalorder %s52_s16, %s752_s0  ;;  %p757_p0 = scmp.lt.s32.totalorder %s52_s16, %s52_s16 }
  0x22   :  { %p758_p1 = scmp.lt.s32.totalorder %s752_s0, %s752_s0 }
  0x24   :  { %p759_p2 = por %p758_p1, %p757_p0 }
  0x26   :  { %p760_p3 = pnand %p759_p2, %p753_p13 }
  0x28   :  { %763 = shalt.err (!%p760_p3)
}
  0x29   :  { %s835_s1 = smov [#allocation10]   ;;  %s61_s20 = sshll.u32 %s2368_s4, 4  ;;  %s62_s20 = int_to_ptr.vmem [resolvable:$true] %s61_s20 }
  0x2a   :  { %54 = dma.vmem_to_smem %s52_s16, 16, %s835_s1, [#allocation9]  }
  0x2b   :  { %s764_s21 = scalar_lea.vmem %s62_s20, 16  ;;  %p769_p5 = scmp.lt.s32.totalorder %s62_s20, %s62_s20 }
  0x2c   :  { %p765_p4 = scmp.ne.s32.totalorder %s62_s20, %s764_s21  ;;  %p770_p6 = scmp.lt.s32.totalorder %s764_s21, %s764_s21 }
  0x2e   :  { %p771_p7 = por %p770_p6, %p769_p5 }
  0x30   :  { %p772_p8 = pnand %p771_p7, %p765_p4 }
  0x32   :  { %775 = shalt.err (!%p772_p8)
}
  0x33   :  { %s836_s22 = smov [#allocation11]   ;;  %s837_s23 = smov [#allocation13]  }
  0x34   :  { %64 = dma.vmem_to_smem %s62_s20, 16, %s836_s22, [#allocation12]  }
  0x35   :  { %s70_s24 = sshll.u32 %s837_s23, 4  ;;  %s776_s27 = scalar_lea.hbm %s2369_s5, 512  ;;  %s71_s24 = int_to_ptr.vmem [resolvable:$true] %s70_s24 }
  0x36   :  { %p777_p9 = scmp.ne.s32.totalorder %s2369_s5, %s776_s27  ;;  %p780_p10 = scmp.lt.u32.totalorder %s776_s27, %s2369_s5 }
  0x38   :  { %p782_p11 = pnand %p780_p10, %p777_p9 }
  0x3a   :  { %785 = shalt.err (!%p782_p11)
}
  0x3b   :  { %s786_s2 = scalar_lea.vmem %s71_s24, 512  ;;  %p791_p13 = scmp.lt.s32.totalorder %s71_s24, %s71_s24 }
  0x3c   :  { %p787_p12 = scmp.ne.s32.totalorder %s71_s24, %s786_s2  ;;  %p792_p0 = scmp.lt.s32.totalorder %s786_s2, %s786_s2 }
  0x3e   :  { %p793_p1 = por %p792_p0, %p791_p13 }
  0x40   :  { %p794_p2 = pnand %p793_p1, %p787_p12 }
  0x42   :  { %797 = shalt.err (!%p794_p2)
}
  0x43   :  { %s838_s7 = smov 128   ;;  %s839_s8 = smov 8  }
  0x44   :  { %76 = dma.hbm_to_vmem [thread:$0]  %s2369_s5, 512, %s71_s24, [#allocation3], %s838_s7, %s838_s7, %s839_s8  }
  0x45   :  { %820 = dma.done.wait [#allocation5], 16  }
  0x46   :  { %821 = vsyncadd [#allocation5], 4294967280 }
  0x47   :  { %822 = dma.done.wait [#allocation6], 16  }
  0x48   :  { %823 = vsyncadd [#allocation6], 4294967280 }
  0x49   :  { %824 = dma.done.wait [#allocation9], 32  }
  0x4a   :  { %825 = vsyncadd [#allocation9], 4294967264 }
  0x4b   :  { %826 = dma.done.wait [#allocation12], 16  }
  0x4c   :  { %827 = vsyncadd [#allocation12], 4294967280 }
  0x4d   :  { %828 = dma.done.wait [#allocation3], 512  }
  0x4e   :  { %829 = vsyncadd [#allocation3], 4294966784 }
  0x4f   :  { %95 = sfence }
  0x50   :  { %s639_s11 = sld [smem:[#allocation2 + $0x1]]  ;;  %s100_s12 = sld [smem:[#allocation2]]  ;;  %v915_v0 = vld [vmem:[#allocation13] sm:$0xff]  ;;  %v917_v1 = vld [vmem:[#allocation13 + $0x8] sm:$0xff]  ;;  %v919_v2 = vld [vmem:[#allocation13 + $0x10] sm:$0xff] }
  0x51   :  { %s102_s13 = sld [smem:[#allocation7]]  ;;  %s640_s15 = sld [smem:[#allocation7 + $0x1]]  ;;  %v921_v4 = vld [vmem:[#allocation13 + $0x18] sm:$0xff] }
  0x52   :  { %s104_s14 = sld [smem:[#allocation8]]  ;;  %s641_s18 = sld [smem:[#allocation8 + $0x1]] }
  0x53   :  { %s106_s16 = sld [smem:[#allocation10]]  ;;  %s642_s5 = sld [smem:[#allocation10 + $0x1]] }
  0x54   :  { %s108_s17 = sld [smem:[#allocation11]]  ;;  %s644_s0 = sld [smem:[#allocation2 + $0x2]] }
  0x55   :  { %s643_s1 = sld [smem:[#allocation11 + $0x1]]  ;;  %s943_s3 = sld [smem:[#allocation7 + $0x2]] }
  0x56   :  { %v111_v3 = vstv %s639_s11  ;;  %v101_v5 = vstv %s100_s12  ;;  %s949_s19 = sld [smem:[#allocation8 + $0x2]]  ;;  %s965_s22 = sld [smem:[#allocation2 + $0x3]] }
  0x57   :  { %vm924_vm0 = vcmp.ge.f32.partialorder %v915_v0, %v111_v3  ;;  %vm929_vm1 = vcmp.ge.f32.partialorder %v917_v1, %v111_v3  ;;  %vm934_vm2 = vcmp.ge.f32.partialorder %v919_v2, %v111_v3  ;;  %v103_v9 = vstv %s102_s13  ;;  %s957_s20 = sld [smem:[#allocation10 + $0x2]]  ;;  %s1013_s23 = sld [smem:[#allocation7 + $0x3]] }
  0x58   :  { %vm939_vm3 = vcmp.ge.f32.partialorder %v921_v4, %v111_v3  ;;  %v121_v11 = vstv %s640_s15  ;;  %v105_v12 = vstv %s104_s14  ;;  %v116_v15 = vsel %vm924_vm0, %v111_v3, %v101_v5  ;;  %s959_s21 = sld [smem:[#allocation11 + $0x2]]  ;;  %s1025_s24 = sld [smem:[#allocation8 + $0x3]] }
  0x59   :  { %v945_v13 = vstv %s106_s16  ;;  %v117_v16 = vsel %vm929_vm1, %v111_v3, %v101_v5  ;;  %v118_v17 = vsel %vm934_vm2, %v111_v3, %v101_v5  ;;  %v127_v18 = vstv %s641_s18  ;;  %s1027_s25 = sld [smem:[#allocation10 + $0x3]]  ;;  %s1051_s26 = sld [smem:[#allocation2 + $0x4]] }
  0x5a   :  { %v947_v14 = vstv %s108_s17  ;;  %v119_v19 = vsel %vm939_vm3, %v111_v3, %v101_v5  ;;  %v122_v20 = vsel %vm924_vm0, %v121_v11, %v103_v9  ;;  %v133_v21 = vstv %s642_s5  ;;  %s1082_s27 = sld [smem:[#allocation11 + $0x3]]  ;;  %s1120_s28 = sld [smem:[#allocation7 + $0x4]] }
  0x5b   :  { %v145_v22 = vstv %s644_s0  ;;  %v123_v23 = vsel %vm929_vm1, %v121_v11, %v103_v9  ;;  %v124_v24 = vsel %vm934_vm2, %v121_v11, %v103_v9  ;;  %v125_v25 = vsel %vm939_vm3, %v121_v11, %v103_v9  ;;  %s1122_s29 = sld [smem:[#allocation8 + $0x4]]  ;;  %s1161_s30 = sld [smem:[#allocation2 + $0x5]] }
  0x5c   :  { %v139_v26 = vstv %s643_s1  ;;  %v128_v27 = vsel %vm924_vm0, %v127_v18, %v105_v12  ;;  %v129_v28 = vsel %vm929_vm1, %v127_v18, %v105_v12  ;;  %v130_v29 = vsel %vm934_vm2, %v127_v18, %v105_v12  ;;  %s1159_s4 = sld [smem:[#allocation10 + $0x4]]  ;;  %s1187_s9 = sld [smem:[#allocation7 + $0x5]] }
  0x5d   :  { %v131_v30 = vsel %vm939_vm3, %v127_v18, %v105_v12  ;;  %v134_v31 = vsel %vm924_vm0, %v133_v21, %v945_v13  ;;  %v135_v32 = vsel %vm929_vm1, %v133_v21, %v945_v13  ;;  %vm988_vm4 = vcmp.ge.f32.partialorder %v915_v0, %v145_v22  ;;  %s1185_s2 = sld [smem:[#allocation11 + $0x4]]  ;;  %s1239_s10 = sld [smem:[#allocation8 + $0x5]] }
  0x5e   :  { %vm993_vm5 = vcmp.ge.f32.partialorder %v917_v1, %v145_v22  ;;  %v136_v35 = vsel %vm934_vm2, %v133_v21, %v945_v13  ;;  %v137_v36 = vsel %vm939_vm3, %v133_v21, %v945_v13  ;;  %vm1004_vm6 = vcmp.ge.f32.partialorder %v919_v2, %v145_v22  ;;  %s1257_s11 = sld [smem:[#allocation10 + $0x5]]  ;;  %s1259_s12 = sld [smem:[#allocation2 + $0x6]] }
  0x5f   :  { %vm1009_vm7 = vcmp.ge.f32.partialorder %v921_v4, %v145_v22  ;;  %v140_v39 = vsel %vm924_vm0, %v139_v26, %v947_v14  ;;  %v141_v40 = vsel %vm929_vm1, %v139_v26, %v947_v14  ;;  %v142_v41 = vsel %vm934_vm2, %v139_v26, %v947_v14  ;;  %s1273_s13 = sld [smem:[#allocation11 + $0x5]]  ;;  %s1343_s14 = sld [smem:[#allocation7 + $0x6]] }
  0x60   :  { %v155_v42 = vstv %s943_s3  ;;  %v143_v43 = vsel %vm939_vm3, %v139_v26, %v947_v14  ;;  %v1034_v44 = vsel %vm988_vm4, %v145_v22, %v116_v15  ;;  %v1038_v45 = vsel %vm993_vm5, %v145_v22, %v117_v16  ;;  %s1361_s15 = sld [smem:[#allocation8 + $0x6]]  ;;  %s1390_s18 = sld [smem:[#allocation2 + $0x7]] }
  0x61   :  { %v161_v46 = vstv %s949_s19  ;;  %v1043_v47 = vsel %vm1004_vm6, %v145_v22, %v118_v17  ;;  %v1047_v48 = vsel %vm1009_vm7, %v145_v22, %v119_v19  ;;  %v167_v49 = vstv %s957_s20  ;;  %s1376_s16 = sld [smem:[#allocation10 + $0x6]]  ;;  %s1449_s5 = sld [smem:[#allocation7 + $0x7]] }
  0x62   :  { %v173_v50 = vstv %s959_s21  ;;  %v1055_v51 = vsel %vm988_vm4, %v155_v42, %v122_v20  ;;  %v1059_v52 = vsel %vm993_vm5, %v155_v42, %v123_v23  ;;  %v1063_v53 = vsel %vm1004_vm6, %v155_v42, %v124_v24  ;;  %s1378_s17 = sld [smem:[#allocation11 + $0x6]]  ;;  %s1461_s0 = sld [smem:[#allocation8 + $0x7]] }
  0x63   :  { %v179_v54 = vstv %s965_s22  ;;  %v1068_v55 = vsel %vm1009_vm7, %v155_v42, %v125_v25  ;;  %v1072_v56 = vsel %vm988_vm4, %v161_v46, %v128_v27  ;;  %v1076_v57 = vsel %vm993_vm5, %v161_v46, %v129_v28  ;;  %s1463_s1 = sld [smem:[#allocation10 + $0x7]]  ;;  %s1487_s3 = sld [smem:[#allocation2 + $0x8]] }
  0x64   :  { %v1080_v58 = vsel %vm1004_vm6, %v161_v46, %v130_v29  ;;  %v1086_v59 = vsel %vm1009_vm7, %v161_v46, %v131_v30  ;;  %v1090_v60 = vsel %vm988_vm4, %v167_v49, %v134_v31  ;;  %v1094_v61 = vsel %vm993_vm5, %v167_v49, %v135_v32  ;;  %s1518_s19 = sld [smem:[#allocation11 + $0x7]]  ;;  %s1556_s20 = sld [smem:[#allocation7 + $0x8]] }
  0x65   :  { %v1098_v62 = vsel %vm1004_vm6, %v167_v49, %v136_v35  ;;  %vm1101_vm8 = vcmp.ge.f32.partialorder %v915_v0, %v179_v54  ;;  %vm1106_vm9 = vcmp.ge.f32.partialorder %v917_v1, %v179_v54  ;;  %vm1111_vm10 = vcmp.ge.f32.partialorder %v919_v2, %v179_v54  ;;  %s1558_s21 = sld [smem:[#allocation8 + $0x8]] }
  0x66   :  { %vm1116_vm11 = vcmp.ge.f32.partialorder %v921_v4, %v179_v54  ;;  %v1126_v7 = vsel %vm1009_vm7, %v167_v49, %v137_v36  ;;  %v1130_v8 = vsel %vm988_vm4, %v173_v50, %v140_v39  ;;  %v1134_v9 = vsel %vm993_vm5, %v173_v50, %v141_v40  ;;  %s1595_s22 = sld [smem:[#allocation10 + $0x8]] }
  0x67   :  { %v189_v10 = vstv %s1013_s23  ;;  %v1139_v11 = vsel %vm1004_vm6, %v173_v50, %v142_v41  ;;  %v1143_v12 = vsel %vm1009_vm7, %v173_v50, %v143_v43  ;;  %v195_v13 = vstv %s1025_s24  ;;  %s1597_s23 = sld [smem:[#allocation2 + $0x9]]  ;;  %s1621_s24 = sld [smem:[#allocation11 + $0x8]] }
  0x68   :  { %v201_v14 = vstv %s1027_s25  ;;  %v184_v15 = vsel %vm1101_vm8, %v179_v54, %v1034_v44  ;;  %v185_v16 = vsel %vm1106_vm9, %v179_v54, %v1038_v45  ;;  %v186_v17 = vsel %vm1111_vm10, %v179_v54, %v1043_v47  ;;  %s1623_s25 = sld [smem:[#allocation7 + $0x9]] }
  0x69   :  { %v187_v18 = vsel %vm1116_vm11, %v179_v54, %v1047_v48  ;;  %v190_v19 = vsel %vm1101_vm8, %v189_v10, %v1055_v51  ;;  %v191_v20 = vsel %vm1106_vm9, %v189_v10, %v1059_v52  ;;  %v192_v21 = vsel %vm1111_vm10, %v189_v10, %v1063_v53 }
  0x6a   :  { %v213_v22 = vstv %s1051_s26  ;;  %v193_v23 = vsel %vm1116_vm11, %v189_v10, %v1068_v55  ;;  %v196_v24 = vsel %vm1101_vm8, %v195_v13, %v1072_v56  ;;  %v197_v25 = vsel %vm1106_vm9, %v195_v13, %v1076_v57  ;;  %s1675_s26 = sld [smem:[#allocation8 + $0x9]] }
  0x6b   :  { %v198_v26 = vsel %vm1111_vm10, %v195_v13, %v1080_v58  ;;  %v199_v27 = vsel %vm1116_vm11, %v195_v13, %v1086_v59  ;;  %v202_v28 = vsel %vm1101_vm8, %v201_v14, %v1090_v60  ;;  %v203_v29 = vsel %vm1106_vm9, %v201_v14, %v1094_v61 }
  0x6c   :  { %v207_v30 = vstv %s1082_s27  ;;  %vm1200_vm12 = vcmp.ge.f32.partialorder %v915_v0, %v213_v22  ;;  %vm1205_vm13 = vcmp.ge.f32.partialorder %v917_v1, %v213_v22  ;;  %vm1210_vm14 = vcmp.ge.f32.partialorder %v919_v2, %v213_v22  ;;  %s1693_s27 = sld [smem:[#allocation10 + $0x9]] }
  0x6d   :  { %vm1215_vm15 = vcmp.ge.f32.partialorder %v921_v4, %v213_v22  ;;  %v204_v35 = vsel %vm1111_vm10, %v201_v14, %v1098_v62  ;;  %v205_v36 = vsel %vm1116_vm11, %v201_v14, %v1126_v7  ;;  %v223_v37 = vstv %s1120_s28  ;;  %s1695_s28 = sld [smem:[#allocation2 + $0xa]] }
  0x6e   :  { %v229_v38 = vstv %s1122_s29  ;;  %v208_v39 = vsel %vm1101_vm8, %v207_v30, %v1130_v8  ;;  %v209_v40 = vsel %vm1106_vm9, %v207_v30, %v1134_v9  ;;  %v210_v41 = vsel %vm1111_vm10, %v207_v30, %v1139_v11  ;;  %s1709_s29 = sld [smem:[#allocation11 + $0x9]] }
  0x6f   :  { %v211_v42 = vsel %vm1116_vm11, %v207_v30, %v1143_v12  ;;  %v1243_v43 = vsel %vm1200_vm12, %v213_v22, %v184_v15  ;;  %v1247_v44 = vsel %vm1205_vm13, %v213_v22, %v185_v16  ;;  %v1251_v45 = vsel %vm1210_vm14, %v213_v22, %v186_v17 }
  0x70   :  { %v1255_v46 = vsel %vm1215_vm15, %v213_v22, %v187_v18  ;;  %v1263_v47 = vsel %vm1200_vm12, %v223_v37, %v190_v19  ;;  %v1267_v48 = vsel %vm1205_vm13, %v223_v37, %v191_v20  ;;  %v235_v49 = vstv %s1159_s4  ;;  %s1779_s4 = sld [smem:[#allocation7 + $0xa]] }
  0x71   :  { %v1271_v50 = vstv %s1161_s30  ;;  %v1277_v51 = vsel %vm1210_vm14, %v223_v37, %v192_v21  ;;  %v1281_v52 = vsel %vm1215_vm15, %v223_v37, %v193_v23  ;;  %v1285_v53 = vsel %vm1200_vm12, %v229_v38, %v196_v24  ;;  %s1797_s30 = sld [smem:[#allocation8 + $0xa]] }
  0x72   :  { %v1289_v54 = vsel %vm1205_vm13, %v229_v38, %v197_v25  ;;  %v1293_v55 = vsel %vm1210_vm14, %v229_v38, %v198_v26  ;;  %v1297_v56 = vsel %vm1215_vm15, %v229_v38, %v199_v27  ;;  %v241_v57 = vstv %s1185_s2  ;;  %s1812_s2 = sld [smem:[#allocation10 + $0xa]] }
  0x73   :  { %v1301_v58 = vstv %s1187_s9  ;;  %v1305_v59 = vsel %vm1200_vm12, %v235_v49, %v202_v28  ;;  %vm1309_vm0 = vcmp.ge.f32.partialorder %v915_v0, %v1271_v50  ;;  %vm1315_vm1 = vcmp.ge.f32.partialorder %v917_v1, %v1271_v50  ;;  %s1814_s9 = sld [smem:[#allocation11 + $0xa]] }
  0x74   :  { %vm1321_vm2 = vcmp.ge.f32.partialorder %v919_v2, %v1271_v50  ;;  %v1327_v63 = vsel %vm1205_vm13, %v235_v49, %v203_v29  ;;  %v1331_v3 = vsel %vm1210_vm14, %v235_v49, %v204_v35  ;;  %v1335_v5 = vsel %vm1215_vm15, %v235_v49, %v205_v36 }
  0x75   :  { %vm1339_vm3 = vcmp.ge.f32.partialorder %v921_v4, %v1271_v50  ;;  %v1347_v7 = vsel %vm1200_vm12, %v241_v57, %v208_v39  ;;  %v1351_v8 = vsel %vm1205_vm13, %v241_v57, %v209_v40  ;;  %v1355_v9 = vsel %vm1210_vm14, %v241_v57, %v210_v41 }
  0x76   :  { %v1359_v10 = vsel %vm1215_vm15, %v241_v57, %v211_v42  ;;  %v252_v11 = vsel %vm1309_vm0, %v1271_v50, %v1243_v43  ;;  %v253_v12 = vsel %vm1315_vm1, %v1271_v50, %v1247_v44  ;;  %v254_v13 = vsel %vm1321_vm2, %v1271_v50, %v1251_v45 }
  0x77   :  { %v263_v14 = vstv %s1239_s10  ;;  %v255_v15 = vsel %vm1339_vm3, %v1271_v50, %v1255_v46  ;;  %v258_v16 = vsel %vm1309_vm0, %v1301_v58, %v1263_v47  ;;  %v269_v17 = vstv %s1257_s11  ;;  %s1826_s10 = sld [smem:[#allocation2 + $0xb]] }
  0x78   :  { %v281_v18 = vstv %s1259_s12  ;;  %v259_v19 = vsel %vm1315_vm1, %v1301_v58, %v1267_v48  ;;  %v260_v20 = vsel %vm1321_vm2, %v1301_v58, %v1277_v51  ;;  %v261_v21 = vsel %vm1339_vm3, %v1301_v58, %v1281_v52  ;;  %s1885_s11 = sld [smem:[#allocation7 + $0xb]] }
  0x79   :  { %v275_v22 = vstv %s1273_s13  ;;  %v264_v23 = vsel %vm1309_vm0, %v263_v14, %v1285_v53  ;;  %v265_v24 = vsel %vm1315_vm1, %v263_v14, %v1289_v54  ;;  %v266_v25 = vsel %vm1321_vm2, %v263_v14, %v1293_v55  ;;  %s1897_s12 = sld [smem:[#allocation8 + $0xb]] }
  0x7a   :  { %v267_v26 = vsel %vm1339_vm3, %v263_v14, %v1297_v56  ;;  %v270_v27 = vsel %vm1309_vm0, %v269_v17, %v1305_v59  ;;  %v271_v28 = vsel %vm1315_vm1, %v269_v17, %v1327_v63  ;;  %vm1424_vm4 = vcmp.ge.f32.partialorder %v915_v0, %v281_v18  ;;  %s1899_s13 = sld [smem:[#allocation10 + $0xb]] }
  0x7b   :  { %vm1429_vm5 = vcmp.ge.f32.partialorder %v917_v1, %v281_v18  ;;  %v272_v31 = vsel %vm1321_vm2, %v269_v17, %v1331_v3  ;;  %v273_v32 = vsel %vm1339_vm3, %v269_v17, %v1335_v5  ;;  %vm1440_vm6 = vcmp.ge.f32.partialorder %v919_v2, %v281_v18 }
  0x7c   :  { %vm1445_vm7 = vcmp.ge.f32.partialorder %v921_v4, %v281_v18  ;;  %v276_v35 = vsel %vm1309_vm0, %v275_v22, %v1347_v7  ;;  %v277_v36 = vsel %vm1315_vm1, %v275_v22, %v1351_v8  ;;  %v278_v37 = vsel %vm1321_vm2, %v275_v22, %v1355_v9 }
  0x7d   :  { %v291_v38 = vstv %s1343_s14  ;;  %v279_v39 = vsel %vm1339_vm3, %v275_v22, %v1359_v10  ;;  %v1470_v40 = vsel %vm1424_vm4, %v281_v18, %v252_v11  ;;  %v1474_v41 = vsel %vm1429_vm5, %v281_v18, %v253_v12  ;;  %s1923_s14 = sld [smem:[#allocation2 + $0xc]] }
  0x7e   :  { %v297_v42 = vstv %s1361_s15  ;;  %v1479_v43 = vsel %vm1440_vm6, %v281_v18, %v254_v13  ;;  %v1483_v44 = vsel %vm1445_vm7, %v281_v18, %v255_v15  ;;  %v303_v45 = vstv %s1376_s16  ;;  %s1956_s15 = sld [smem:[#allocation11 + $0xb]]  ;;  %s1998_s16 = sld [smem:[#allocation7 + $0xc]] }
  0x7f   :  { %v309_v46 = vstv %s1378_s17  ;;  %v1491_v47 = vsel %vm1424_vm4, %v291_v38, %v258_v16  ;;  %v1495_v48 = vsel %vm1429_vm5, %v291_v38, %v259_v19  ;;  %v1499_v49 = vsel %vm1440_vm6, %v291_v38, %v260_v20  ;;  %s2000_s17 = sld [smem:[#allocation8 + $0xc]] }
  0x80   :  { %v315_v50 = vstv %s1390_s18  ;;  %v1504_v51 = vsel %vm1445_vm7, %v291_v38, %v261_v21  ;;  %v1508_v52 = vsel %vm1424_vm4, %v297_v42, %v264_v23  ;;  %v1512_v53 = vsel %vm1429_vm5, %v297_v42, %v265_v24  ;;  %s2041_s18 = sld [smem:[#allocation10 + $0xc]] }
  0x81   :  { %v1516_v54 = vsel %vm1440_vm6, %v297_v42, %v266_v25  ;;  %v1522_v55 = vsel %vm1445_vm7, %v297_v42, %v267_v26  ;;  %v1526_v56 = vsel %vm1424_vm4, %v303_v45, %v270_v27  ;;  %v1530_v57 = vsel %vm1429_vm5, %v303_v45, %v271_v28 }
  0x82   :  { %v1534_v58 = vsel %vm1440_vm6, %v303_v45, %v272_v31  ;;  %vm1537_vm8 = vcmp.ge.f32.partialorder %v915_v0, %v315_v50  ;;  %vm1542_vm9 = vcmp.ge.f32.partialorder %v917_v1, %v315_v50  ;;  %vm1547_vm10 = vcmp.ge.f32.partialorder %v919_v2, %v315_v50 }
  0x83   :  { %vm1552_vm11 = vcmp.ge.f32.partialorder %v921_v4, %v315_v50  ;;  %v1562_v63 = vsel %vm1445_vm7, %v303_v45, %v273_v32  ;;  %v1566_v3 = vsel %vm1424_vm4, %v309_v46, %v276_v35  ;;  %v1570_v5 = vsel %vm1429_vm5, %v309_v46, %v277_v36 }
  0x84   :  { %v325_v6 = vstv %s1449_s5  ;;  %v1575_v7 = vsel %vm1440_vm6, %v309_v46, %v278_v37  ;;  %v1579_v8 = vsel %vm1445_vm7, %v309_v46, %v279_v39  ;;  %v331_v9 = vstv %s1461_s0  ;;  %s2043_s5 = sld [smem:[#allocation2 + $0xd]]  ;;  %s2067_s0 = sld [smem:[#allocation11 + $0xc]] }
  0x85   :  { %v337_v10 = vstv %s1463_s1  ;;  %v320_v11 = vsel %vm1537_vm8, %v315_v50, %v1470_v40  ;;  %v321_v12 = vsel %vm1542_vm9, %v315_v50, %v1474_v41  ;;  %v322_v13 = vsel %vm1547_vm10, %v315_v50, %v1479_v43  ;;  %s2069_s1 = sld [smem:[#allocation7 + $0xd]] }
  0x86   :  { %v323_v14 = vsel %vm1552_vm11, %v315_v50, %v1483_v44  ;;  %v326_v15 = vsel %vm1537_vm8, %v325_v6, %v1491_v47  ;;  %v327_v16 = vsel %vm1542_vm9, %v325_v6, %v1495_v48  ;;  %v328_v17 = vsel %vm1547_vm10, %v325_v6, %v1499_v49 }
  0x87   :  { %v349_v18 = vstv %s1487_s3  ;;  %v329_v19 = vsel %vm1552_vm11, %v325_v6, %v1504_v51  ;;  %v332_v20 = vsel %vm1537_vm8, %v331_v9, %v1508_v52  ;;  %v333_v21 = vsel %vm1542_vm9, %v331_v9, %v1512_v53  ;;  %s2109_s3 = sld [smem:[#allocation8 + $0xd]] }
  0x88   :  { %v334_v22 = vsel %vm1547_vm10, %v331_v9, %v1516_v54  ;;  %v335_v23 = vsel %vm1552_vm11, %v331_v9, %v1522_v55  ;;  %v338_v24 = vsel %vm1537_vm8, %v337_v10, %v1526_v56  ;;  %v339_v25 = vsel %vm1542_vm9, %v337_v10, %v1530_v57 }
  0x89   :  { %v343_v26 = vstv %s1518_s19  ;;  %vm1636_vm12 = vcmp.ge.f32.partialorder %v915_v0, %v349_v18  ;;  %vm1641_vm13 = vcmp.ge.f32.partialorder %v917_v1, %v349_v18  ;;  %vm1646_vm14 = vcmp.ge.f32.partialorder %v919_v2, %v349_v18  ;;  %s2123_s19 = sld [smem:[#allocation2 + $0xe]] }
  0x8a   :  { %vm1651_vm15 = vcmp.ge.f32.partialorder %v921_v4, %v349_v18  ;;  %v340_v31 = vsel %vm1547_vm10, %v337_v10, %v1534_v58  ;;  %v341_v32 = vsel %vm1552_vm11, %v337_v10, %v1562_v63  ;;  %v359_v33 = vstv %s1556_s20  ;;  %s2133_s20 = sld [smem:[#allocation10 + $0xd]] }
  0x8b   :  { %v365_v34 = vstv %s1558_s21  ;;  %v344_v35 = vsel %vm1537_vm8, %v343_v26, %v1566_v3  ;;  %v345_v36 = vsel %vm1542_vm9, %v343_v26, %v1570_v5  ;;  %v346_v37 = vsel %vm1547_vm10, %v343_v26, %v1575_v7  ;;  %s2135_s21 = sld [smem:[#allocation11 + $0xd]] }
  0x8c   :  { %v347_v38 = vsel %vm1552_vm11, %v343_v26, %v1579_v8  ;;  %v1679_v39 = vsel %vm1636_vm12, %v349_v18, %v320_v11  ;;  %v1683_v40 = vsel %vm1641_vm13, %v349_v18, %v321_v12  ;;  %v1687_v41 = vsel %vm1646_vm14, %v349_v18, %v322_v13 }
  0x8d   :  { %v1691_v42 = vsel %vm1651_vm15, %v349_v18, %v323_v14  ;;  %v1699_v43 = vsel %vm1636_vm12, %v359_v33, %v326_v15  ;;  %v1703_v44 = vsel %vm1641_vm13, %v359_v33, %v327_v16  ;;  %v371_v45 = vstv %s1595_s22  ;;  %s2189_s22 = sld [smem:[#allocation11 + $0xe]] }
  0x8e   :  { %v1707_v46 = vstv %s1597_s23  ;;  %v1713_v47 = vsel %vm1646_vm14, %v359_v33, %v328_v17  ;;  %v1717_v48 = vsel %vm1651_vm15, %v359_v33, %v329_v19  ;;  %v1721_v49 = vsel %vm1636_vm12, %v365_v34, %v332_v20  ;;  %s2214_s23 = sld [smem:[#allocation8 + $0xe]] }
  0x8f   :  { %v1725_v50 = vsel %vm1641_vm13, %v365_v34, %v333_v21  ;;  %v1729_v51 = vsel %vm1646_vm14, %v365_v34, %v334_v22  ;;  %v1733_v52 = vsel %vm1651_vm15, %v365_v34, %v335_v23  ;;  %v377_v53 = vstv %s1621_s24  ;;  %s2216_s24 = sld [smem:[#allocation10 + $0xe]] }
  0x90   :  { %v1737_v54 = vstv %s1623_s25  ;;  %v1741_v55 = vsel %vm1636_vm12, %v371_v45, %v338_v24  ;;  %vm1745_vm0 = vcmp.ge.f32.partialorder %v915_v0, %v1707_v46  ;;  %vm1751_vm1 = vcmp.ge.f32.partialorder %v917_v1, %v1707_v46  ;;  %s2277_s25 = sld [smem:[#allocation7 + $0xe]] }
  0x91   :  { %vm1757_vm2 = vcmp.ge.f32.partialorder %v919_v2, %v1707_v46  ;;  %v1763_v59 = vsel %vm1641_vm13, %v371_v45, %v339_v25  ;;  %v1767_v60 = vsel %vm1646_vm14, %v371_v45, %v340_v31  ;;  %v1771_v61 = vsel %vm1651_vm15, %v371_v45, %v341_v32 }
  0x92   :  { %vm1775_vm3 = vcmp.ge.f32.partialorder %v921_v4, %v1707_v46  ;;  %v1783_v63 = vsel %vm1636_vm12, %v377_v53, %v344_v35  ;;  %v1787_v3 = vsel %vm1641_vm13, %v377_v53, %v345_v36  ;;  %v1791_v5 = vsel %vm1646_vm14, %v377_v53, %v346_v37 }
  0x93   :  { %v1795_v6 = vsel %vm1651_vm15, %v377_v53, %v347_v38  ;;  %v388_v7 = vsel %vm1745_vm0, %v1707_v46, %v1679_v39  ;;  %v389_v8 = vsel %vm1751_vm1, %v1707_v46, %v1683_v40  ;;  %v390_v9 = vsel %vm1757_vm2, %v1707_v46, %v1687_v41 }
  0x94   :  { %v399_v10 = vstv %s1675_s26  ;;  %v391_v11 = vsel %vm1775_vm3, %v1707_v46, %v1691_v42  ;;  %v394_v12 = vsel %vm1745_vm0, %v1737_v54, %v1699_v43  ;;  %v405_v13 = vstv %s1693_s27  ;;  %s840_s26 = smov [#allocation14]  }
  0x95   :  { %v417_v14 = vstv %s1695_s28  ;;  %v395_v15 = vsel %vm1751_vm1, %v1737_v54, %v1703_v44  ;;  %v396_v16 = vsel %vm1757_vm2, %v1737_v54, %v1713_v47  ;;  %v397_v17 = vsel %vm1775_vm3, %v1737_v54, %v1717_v48  ;;  %s623_s27 = sshll.u32 %s840_s26, 4  ;;  %s624_s27 = int_to_ptr.vmem [resolvable:$true] %s623_s27 }
  0x96   :  { %v411_v18 = vstv %s1709_s29  ;;  %v400_v19 = vsel %vm1745_vm0, %v399_v10, %v1721_v49  ;;  %v401_v20 = vsel %vm1751_vm1, %v399_v10, %v1725_v50  ;;  %v402_v21 = vsel %vm1757_vm2, %v399_v10, %v1729_v51  ;;  %s798_s28 = scalar_lea.vmem %s624_s27, 512  ;;  %p803_p4 = scmp.lt.s32.totalorder %s624_s27, %s624_s27 }
  0x97   :  { %v403_v22 = vsel %vm1775_vm3, %v399_v10, %v1733_v52  ;;  %v406_v23 = vsel %vm1745_vm0, %v405_v13, %v1741_v55  ;;  %v407_v24 = vsel %vm1751_vm1, %v405_v13, %v1763_v59  ;;  %vm1860_vm4 = vcmp.ge.f32.partialorder %v915_v0, %v417_v14  ;;  %p799_p3 = scmp.ne.s32.totalorder %s624_s27, %s798_s28  ;;  %p804_p5 = scmp.lt.s32.totalorder %s798_s28, %s798_s28 }
  0x98   :  { %vm1865_vm5 = vcmp.ge.f32.partialorder %v917_v1, %v417_v14  ;;  %v408_v27 = vsel %vm1757_vm2, %v405_v13, %v1767_v60  ;;  %v409_v28 = vsel %vm1775_vm3, %v405_v13, %v1771_v61  ;;  %vm1876_vm6 = vcmp.ge.f32.partialorder %v919_v2, %v417_v14 }
  0x99   :  { %vm1881_vm7 = vcmp.ge.f32.partialorder %v921_v4, %v417_v14  ;;  %v412_v31 = vsel %vm1745_vm0, %v411_v18, %v1783_v63  ;;  %v413_v32 = vsel %vm1751_vm1, %v411_v18, %v1787_v3  ;;  %v414_v33 = vsel %vm1757_vm2, %v411_v18, %v1791_v5  ;;  %p805_p6 = por %p804_p5, %p803_p4 }
  0x9a   :  { %v427_v34 = vstv %s1779_s4  ;;  %v415_v35 = vsel %vm1775_vm3, %v411_v18, %v1795_v6  ;;  %v1906_v36 = vsel %vm1860_vm4, %v417_v14, %v388_v7  ;;  %v1910_v37 = vsel %vm1865_vm5, %v417_v14, %v389_v8 }
  0x9b   :  { %v433_v38 = vstv %s1797_s30  ;;  %v1915_v39 = vsel %vm1876_vm6, %v417_v14, %v390_v9  ;;  %v1919_v40 = vsel %vm1881_vm7, %v417_v14, %v391_v11  ;;  %v439_v41 = vstv %s1812_s2  ;;  %p806_p7 = pnand %p805_p6, %p799_p3 }
  0x9c   :  { %v445_v42 = vstv %s1814_s9  ;;  %v1927_v43 = vsel %vm1860_vm4, %v427_v34, %v394_v12  ;;  %v1931_v44 = vsel %vm1865_vm5, %v427_v34, %v395_v15  ;;  %v1935_v45 = vsel %vm1876_vm6, %v427_v34, %v396_v16 }
  0x9d   :  { %v1938_v46 = vstv %s1826_s10  ;;  %v1942_v47 = vsel %vm1881_vm7, %v427_v34, %v397_v17  ;;  %v1946_v48 = vsel %vm1860_vm4, %v433_v38, %v400_v19  ;;  %v1950_v49 = vsel %vm1865_vm5, %v433_v38, %v401_v20 }
  0x9e   :  { %v1954_v50 = vsel %vm1876_vm6, %v433_v38, %v402_v21  ;;  %v1960_v51 = vsel %vm1881_vm7, %v433_v38, %v403_v22  ;;  %v1964_v52 = vsel %vm1860_vm4, %v439_v41, %v406_v23  ;;  %v1968_v53 = vsel %vm1865_vm5, %v439_v41, %v407_v24 }
  0x9f   :  { %v1972_v54 = vsel %vm1876_vm6, %v439_v41, %v408_v27  ;;  %vm1976_vm8 = vcmp.ge.f32.partialorder %v915_v0, %v1938_v46  ;;  %vm1982_vm9 = vcmp.ge.f32.partialorder %v917_v1, %v1938_v46  ;;  %vm1988_vm10 = vcmp.ge.f32.partialorder %v919_v2, %v1938_v46 }
  0xa0   :  { %vm1994_vm11 = vcmp.ge.f32.partialorder %v921_v4, %v1938_v46  ;;  %v2004_v59 = vsel %vm1881_vm7, %v439_v41, %v409_v28  ;;  %v2008_v60 = vsel %vm1860_vm4, %v445_v42, %v412_v31  ;;  %v2012_v61 = vsel %vm1865_vm5, %v445_v42, %v413_v32 }
  0xa1   :  { %v461_v62 = vstv %s1885_s11  ;;  %v2017_v63 = vsel %vm1876_vm6, %v445_v42, %v414_v33  ;;  %v2021_v3 = vsel %vm1881_vm7, %v445_v42, %v415_v35  ;;  %v467_v5 = vstv %s1897_s12 }
  0xa2   :  { %v473_v6 = vstv %s1899_s13  ;;  %v456_v7 = vsel %vm1976_vm8, %v1938_v46, %v1906_v36  ;;  %v457_v8 = vsel %vm1982_vm9, %v1938_v46, %v1910_v37  ;;  %v458_v9 = vsel %vm1988_vm10, %v1938_v46, %v1915_v39 }
  0xa3   :  { %v459_v10 = vsel %vm1994_vm11, %v1938_v46, %v1919_v40  ;;  %v462_v11 = vsel %vm1976_vm8, %v461_v62, %v1927_v43  ;;  %v463_v12 = vsel %vm1982_vm9, %v461_v62, %v1931_v44  ;;  %v464_v13 = vsel %vm1988_vm10, %v461_v62, %v1935_v45 }
  0xa4   :  { %v485_v14 = vstv %s1923_s14  ;;  %v465_v15 = vsel %vm1994_vm11, %v461_v62, %v1942_v47  ;;  %v468_v16 = vsel %vm1976_vm8, %v467_v5, %v1946_v48  ;;  %v469_v17 = vsel %vm1982_vm9, %v467_v5, %v1950_v49 }
  0xa5   :  { %v470_v18 = vsel %vm1988_vm10, %v467_v5, %v1954_v50  ;;  %v471_v19 = vsel %vm1994_vm11, %v467_v5, %v1960_v51  ;;  %v474_v20 = vsel %vm1976_vm8, %v473_v6, %v1964_v52  ;;  %v475_v21 = vsel %vm1982_vm9, %v473_v6, %v1968_v53 }
  0xa6   :  { %v479_v22 = vstv %s1956_s15  ;;  %vm2082_vm12 = vcmp.ge.f32.partialorder %v915_v0, %v485_v14  ;;  %vm2087_vm13 = vcmp.ge.f32.partialorder %v917_v1, %v485_v14  ;;  %vm2092_vm14 = vcmp.ge.f32.partialorder %v919_v2, %v485_v14 }
  0xa7   :  { %vm2097_vm15 = vcmp.ge.f32.partialorder %v921_v4, %v485_v14  ;;  %v476_v27 = vsel %vm1988_vm10, %v473_v6, %v1972_v54  ;;  %v477_v28 = vsel %vm1994_vm11, %v473_v6, %v2004_v59  ;;  %v495_v29 = vstv %s1998_s16 }
  0xa8   :  { %v501_v30 = vstv %s2000_s17  ;;  %v480_v31 = vsel %vm1976_vm8, %v479_v22, %v2008_v60  ;;  %v481_v32 = vsel %vm1982_vm9, %v479_v22, %v2012_v61  ;;  %v482_v33 = vsel %vm1988_vm10, %v479_v22, %v2017_v63 }
  0xa9   :  { %v483_v34 = vsel %vm1994_vm11, %v479_v22, %v2021_v3  ;;  %v490_v35 = vsel %vm2082_vm12, %v485_v14, %v456_v7  ;;  %v491_v36 = vsel %vm2087_vm13, %v485_v14, %v457_v8  ;;  %v492_v37 = vsel %vm2092_vm14, %v485_v14, %v458_v9 }
  0xaa   :  { %v493_v38 = vsel %vm2097_vm15, %v485_v14, %v459_v10  ;;  %v2139_v39 = vsel %vm2082_vm12, %v495_v29, %v462_v11  ;;  %v2143_v40 = vsel %vm2087_vm13, %v495_v29, %v463_v12  ;;  %v507_v41 = vstv %s2041_s18 }
  0xab   :  { %v519_v42 = vstv %s2043_s5  ;;  %v2149_v43 = vsel %vm2092_vm14, %v495_v29, %v464_v13  ;;  %v2153_v44 = vsel %vm2097_vm15, %v495_v29, %v465_v15  ;;  %v2157_v45 = vsel %vm2082_vm12, %v501_v30, %v468_v16 }
  0xac   :  { %v2161_v46 = vsel %vm2087_vm13, %v501_v30, %v469_v17  ;;  %v2165_v47 = vsel %vm2092_vm14, %v501_v30, %v470_v18  ;;  %v2169_v48 = vsel %vm2097_vm15, %v501_v30, %v471_v19  ;;  %v513_v49 = vstv %s2067_s0 }
  0xad   :  { %v2173_v50 = vstv %s2069_s1  ;;  %v508_v51 = vsel %vm2082_vm12, %v507_v41, %v474_v20  ;;  %v509_v52 = vsel %vm2087_vm13, %v507_v41, %v475_v21  ;;  %vm2180_vm0 = vcmp.ge.f32.partialorder %v915_v0, %v519_v42 }
  0xae   :  { %vm2185_vm1 = vcmp.ge.f32.partialorder %v917_v1, %v519_v42  ;;  %v510_v55 = vsel %vm2092_vm14, %v507_v41, %v476_v27  ;;  %v511_v56 = vsel %vm2097_vm15, %v507_v41, %v477_v28  ;;  %vm2196_vm2 = vcmp.ge.f32.partialorder %v919_v2, %v519_v42 }
  0xaf   :  { %vm2201_vm3 = vcmp.ge.f32.partialorder %v921_v4, %v519_v42  ;;  %v514_v59 = vsel %vm2082_vm12, %v513_v49, %v480_v31  ;;  %v515_v60 = vsel %vm2087_vm13, %v513_v49, %v481_v32  ;;  %v516_v61 = vsel %vm2092_vm14, %v513_v49, %v482_v33 }
  0xb0   :  { %v2212_v62 = vstv %s2109_s3  ;;  %v517_v63 = vsel %vm2097_vm15, %v513_v49, %v483_v34  ;;  %v524_v3 = vsel %vm2180_vm0, %v519_v42, %v490_v35  ;;  %v525_v5 = vsel %vm2185_vm1, %v519_v42, %v491_v36 }
  0xb1   :  { %v553_v6 = vstv %s2123_s19  ;;  %v526_v7 = vsel %vm2196_vm2, %v519_v42, %v492_v37  ;;  %v527_v8 = vsel %vm2201_vm3, %v519_v42, %v493_v38  ;;  %v541_v9 = vstv %s2133_s20 }
  0xb2   :  { %v547_v10 = vstv %s2135_s21  ;;  %v530_v11 = vsel %vm2180_vm0, %v2173_v50, %v2139_v39  ;;  %v536_v12 = vsel %vm2180_vm0, %v2212_v62, %v2157_v45  ;;  %v537_v13 = vsel %vm2185_vm1, %v2212_v62, %v2161_v46 }
  0xb3   :  { %v538_v14 = vsel %vm2196_vm2, %v2212_v62, %v2165_v47  ;;  %vm2248_vm4 = vcmp.ge.f32.partialorder %v915_v0, %v553_v6  ;;  %vm2253_vm5 = vcmp.ge.f32.partialorder %v917_v1, %v553_v6  ;;  %vm2258_vm6 = vcmp.ge.f32.partialorder %v919_v2, %v553_v6 }
  0xb4   :  { %vm2263_vm7 = vcmp.ge.f32.partialorder %v921_v4, %v553_v6  ;;  %v539_v19 = vsel %vm2201_vm3, %v2212_v62, %v2169_v48  ;;  %v542_v20 = vsel %vm2180_vm0, %v541_v9, %v508_v51  ;;  %v543_v21 = vsel %vm2185_vm1, %v541_v9, %v509_v52 }
  0xb5   :  { %v548_v22 = vsel %vm2180_vm0, %v547_v10, %v514_v59  ;;  %v549_v23 = vsel %vm2185_vm1, %v547_v10, %v515_v60  ;;  %v550_v24 = vsel %vm2196_vm2, %v547_v10, %v516_v61  ;;  %v551_v25 = vsel %vm2201_vm3, %v547_v10, %v517_v63 }
  0xb6   :  { %v581_v26 = vstv %s2189_s22  ;;  %v558_v27 = vsel %vm2248_vm4, %v553_v6, %v524_v3  ;;  %v559_v28 = vsel %vm2253_vm5, %v553_v6, %v525_v5  ;;  %v560_v29 = vsel %vm2258_vm6, %v553_v6, %v526_v7 }
  0xb7   :  { %v561_v30 = vsel %vm2263_vm7, %v553_v6, %v527_v8  ;;  %v544_v31 = vsel %vm2196_vm2, %v541_v9, %v510_v55  ;;  %v545_v32 = vsel %vm2201_vm3, %v541_v9, %v511_v56  ;;  %v569_v33 = vstv %s2214_s23 }
  0xb8   :  { %v575_v34 = vstv %s2216_s24  ;;  %v582_v35 = vsel %vm2248_vm4, %v581_v26, %v548_v22  ;;  %v583_v36 = vsel %vm2253_vm5, %v581_v26, %v549_v23  ;;  %v584_v37 = vsel %vm2258_vm6, %v581_v26, %v550_v24 }
  0xb9   :  { %v585_v38 = vsel %vm2263_vm7, %v581_v26, %v551_v25  ;;  %v586_v39 = vsub.f32 %v915_v0, %v558_v27  ;;  %v587_v41 = vsub.f32 %v917_v1, %v559_v28  ;;  %v588_v42 = vsub.f32 %v919_v2, %v560_v29 }
  0xba   :  { %v589_v45 = vsub.f32 %v921_v4, %v561_v30  ;;  %v576_v46 = vsel %vm2248_vm4, %v575_v34, %v542_v20  ;;  %v577_v47 = vsel %vm2253_vm5, %v575_v34, %v543_v21  ;;  %v578_v48 = vsel %vm2258_vm6, %v575_v34, %v544_v31 }
  0xbb   :  { %v579_v49 = vsel %vm2263_vm7, %v575_v34, %v545_v32  ;;  %v590_v51 = vmul.f32 %v586_v39, %v582_v35  ;;  %v591_v0 = vmul.f32 %v587_v41, %v583_v36  ;;  %v592_v52 = vmul.f32 %v588_v42, %v584_v37 }
  0xbc   :  { %v593_v1 = vmul.f32 %v589_v45, %v585_v38  ;;  %v531_v2 = vsel %vm2185_vm1, %v2173_v50, %v2143_v40  ;;  %v532_v4 = vsel %vm2196_vm2, %v2173_v50, %v2149_v43  ;;  %v533_v53 = vsel %vm2201_vm3, %v2173_v50, %v2153_v44 }
  0xbd   :  { %v563_v55 = vstv %s2277_s25  ;;  %v594_v56 = vadd.f32 %v590_v51, %v576_v46  ;;  %v595_v59 = vadd.f32 %v591_v0, %v577_v47  ;;  %v596_v60 = vadd.f32 %v592_v52, %v578_v48 }
  0xbe   :  { %v597_v61 = vadd.f32 %v593_v1, %v579_v49  ;;  %v570_v62 = vsel %vm2248_vm4, %v569_v33, %v536_v12  ;;  %v571_v40 = vsel %vm2253_vm5, %v569_v33, %v537_v13  ;;  %v572_v54 = vsel %vm2258_vm6, %v569_v33, %v538_v14 }
  0xbf   :  { %v573_v43 = vsel %vm2263_vm7, %v569_v33, %v539_v19  ;;  %v598_v57 = vmul.f32 %v594_v56, %v586_v39  ;;  %v599_v58 = vmul.f32 %v595_v59, %v587_v41  ;;  %v600_v44 = vmul.f32 %v596_v60, %v588_v42 }
  0xc0   :  { %v601_v50 = vmul.f32 %v597_v61, %v589_v45  ;;  %v564_v7 = vsel %vm2248_vm4, %v563_v55, %v530_v11  ;;  %v565_v8 = vsel %vm2253_vm5, %v563_v55, %v531_v2  ;;  %v566_v9 = vsel %vm2258_vm6, %v563_v55, %v532_v4 }
  0xc1   :  { %v602_v63 = vadd.f32 %v598_v57, %v570_v62  ;;  %v603_v3 = vadd.f32 %v599_v58, %v571_v40  ;;  %v604_v5 = vadd.f32 %v600_v44, %v572_v54  ;;  %v567_v10 = vsel %vm2263_vm7, %v563_v55, %v533_v53 }
  0xc2   :  { %v605_v6 = vadd.f32 %v601_v50, %v573_v43 }
  0xc3   :  { %v606_v12 = vmul.f32 %v602_v63, %v586_v39  ;;  %v607_v13 = vmul.f32 %v603_v3, %v587_v41  ;;  %v608_v14 = vmul.f32 %v604_v5, %v588_v42 }
  0xc4   :  { %v609_v19 = vmul.f32 %v605_v6, %v589_v45 }
  0xc5   :  { %v610_v20 = vadd.f32 %v606_v12, %v564_v7  ;;  %v611_v21 = vadd.f32 %v607_v13, %v565_v8  ;;  %v612_v22 = vadd.f32 %v608_v14, %v566_v9 }
  0xc6   :  { %v613_v15 = vadd.f32 %v609_v19, %v567_v10 }
  0xc7   :  { %614 = vst [vmem:[#allocation14] sm:$0xff] %v610_v20  ;;  %615 = vst [vmem:[#allocation14 + $0x8] sm:$0xff] %v611_v21 }
  0xc8   :  { %616 = vst [vmem:[#allocation14 + $0x10] sm:$0xff] %v612_v22  ;;  %617 = vst [vmem:[#allocation14 + $0x18] sm:$0xff] %v613_v15 }
  0xc9   :  { %809 = shalt.err (!%p806_p7)
}
  0xca   :  { %s810_s30 = scalar_lea.hbm %s2370_s6, 512 }
  0xcb   :  { %p811_p8 = scmp.ne.s32.totalorder %s2370_s6, %s810_s30  ;;  %p814_p9 = scmp.lt.u32.totalorder %s810_s30, %s2370_s6 }
  0xcd   :  { %p816_p10 = pnand %p814_p9, %p811_p8 }
  0xcf   :  { %819 = shalt.err (!%p816_p10)
}
  0xd0   :  { %629 = dma.vmem_to_hbm [thread:$0]  %s624_s27, 512, %s2370_s6, [#allocation4], %s838_s7, %s838_s7, %s839_s8  }
  0xd1   :  { %830 = dma.done.wait [#allocation4], 512  }
  0xd2   :  { %831 = vsyncadd [#allocation4], 4294966784 }
  0xd3   :  { %633 = vsyncpa [#allocation3], 1 }
  0xd4   :  { %634 = vsyncpa [#allocation4], 1 }
  0xd5   :  { %635 = vsyncpa [#allocation5], 1 }
  0xd6   :  { %636 = vsyncpa [#allocation6], 1 }
  0xd7   :  { %637 = vsyncpa [#allocation9], 1 }
  0xd8   :  { %638 = vsyncpa [#allocation12], 1 }

</bundles_post_ra>
